<compile_context>
chip_gen: v7x
topology: tpu7x:2x2x1
jax: 0.10.0
libtpu: 0.0.40
codegen_flags: <defaults>
</compile_context>

<pallas_src>
import jax
import jax.numpy as jnp
from jax.experimental import pallas as pl
from jax.experimental.pallas import tpu as pltpu

INPUT_SIZE = 28 * 28   # 784
H1, H2, H3 = 512, 256, 128
NUM_CLASSES = 10       # linear4 (128 -> 10) is unused in forward()


def _mlp_kernel(x_ref, w1_ref, b1_ref, w2_ref, b2_ref, w3_ref, b3_ref, o_ref):
    # All three matmuls fused; intermediates stay in vregs/VMEM.
    # bf16 operands -> MXU native rate; f32 accumulation + f32 bias add.
    x = x_ref[...]                                                    # bf16
    h1 = jnp.dot(x, w1_ref[...], preferred_element_type=jnp.float32) + b1_ref[...]
    h1 = jnp.maximum(h1, 0.0).astype(jnp.bfloat16)
    h2 = jnp.dot(h1, w2_ref[...], preferred_element_type=jnp.float32) + b2_ref[...]
    h2 = jnp.maximum(h2, 0.0).astype(jnp.bfloat16)
    h3 = jnp.dot(h2, w3_ref[...], preferred_element_type=jnp.float32) + b3_ref[...]
    h3 = jnp.maximum(h3, 0.0)
    # Dropout with p=0.0 is the identity (and is identity in eval mode anyway).
    o_ref[...] = h3.astype(o_ref.dtype)


def _choose_block_b(B):
    """Batch-tile selection.

    - B <= 512: one grid step (block_b = B). The kernel is memory-bound on the
      weight stream; extra grid steps only add ~0.35 us/step overhead.
    - larger B: 256-row tiles (MXU row width on v6e/v7x; 2x128 rows on v5e),
      giving >= 2 parallel grid steps so both v7x TensorCores are used.
    """
    if B <= 512:
        return B
    for bb in (256, 128, 64, 32, 16, 8):
        if B % bb == 0:
            return bb
    return B  # awkward batch size: fall back to a single step


def simple_fc_forward(x, params, *, block_b=None):
    """x: (B, 784) float -> (B, 128) float32."""
    w1, b1, w2, b2, w3, b3 = params
    B = x.shape[0]
    if block_b is None:
        block_b = _choose_block_b(B)
    assert B % block_b == 0, "batch must be a multiple of block_b"
    grid = (B // block_b,)

    x = x.astype(jnp.bfloat16)

    # Advisory cost estimate (helps XLA schedule this call in a larger graph).
    flops = 2 * B * (INPUT_SIZE * H1 + H1 * H2 + H2 * H3)
    weight_bytes = 2 * (INPUT_SIZE * H1 + H1 * H2 + H2 * H3) + 4 * (H1 + H2 + H3)
    bytes_accessed = B * INPUT_SIZE * 2 + weight_bytes + B * H3 * 4
    cost = pl.CostEstimate(flops=flops, transcendentals=0,
                           bytes_accessed=bytes_accessed)

    # Whole-array (grid-invariant) blocks for weights/biases.
    full = lambda shape: pl.BlockSpec(shape, lambda i: tuple(0 for _ in shape))

    return pl.pallas_call(
        _mlp_kernel,
        out_shape=jax.ShapeDtypeStruct((B, H3), jnp.float32),
        grid=grid,
        in_specs=[
            pl.BlockSpec((block_b, INPUT_SIZE), lambda i: (i, 0)),  # x tile
            full((INPUT_SIZE, H1)),  # w1 (whole, bf16)
            full((1, H1)),           # b1 (f32)
            full((H1, H2)),          # w2
            full((1, H2)),           # b2
            full((H2, H3)),          # w3
            full((1, H3)),           # b3
        ],
        out_specs=pl.BlockSpec((block_b, H3), lambda i: (i, 0)),
        compiler_params=pltpu.CompilerParams(
            dimension_semantics=("parallel",),
            # Tiny footprint (~2 MB of tiles + ~1.1 MB bf16 weights); 32 MiB is
            # explicit and safe on every generation incl. v7x (64 MiB physical).
            vmem_limit_bytes=32 * 1024 * 1024,
        ),
        cost_estimate=cost,
    )(x, w1, b1, w2, b2, w3, b3)


def init_params(key):
    """Deterministic init mimicking nn.Linear default: U(-1/sqrt(fan_in), +1/sqrt(fan_in)).

    Weights stored as (in_features, out_features) in bf16 (streamed dtype);
    biases stored as (1, out_features) in f32.
    """
    dims = [(INPUT_SIZE, H1), (H1, H2), (H2, H3)]
    params = []
    for fan_in, fan_out in dims:
        key, kw, kb = jax.random.split(key, 3)
        bound = 1.0 / jnp.sqrt(jnp.float32(fan_in))
        w = jax.random.uniform(kw, (fan_in, fan_out), jnp.float32, -bound, bound)
        b = jax.random.uniform(kb, (1, fan_out), jnp.float32, -bound, bound)
        params += [w.astype(jnp.bfloat16), b]
    # linear4 (128 -> NUM_CLASSES) is defined in the PyTorch module but unused
    # in forward(); not allocated for the hot path.
    return tuple(params)


if __name__ == "__main__":
    key = jax.random.PRNGKey(0)
    key, kx = jax.random.split(key)

    B = 16  # small batch -> single grid step, block_b = B
    x = jax.random.normal(kx, (B, INPUT_SIZE), jnp.float32)

    params = init_params(key)

    out = simple_fc_forward(x, params)
    out = jax.block_until_ready(out)

    # Reference in plain JAX with the same bf16 operand / f32 accumulation math.
    w1, b1, w2, b2, w3, b3 = params
    xb = x.astype(jnp.bfloat16)
    ref = jnp.maximum(
        jnp.dot(xb, w1, preferred_element_type=jnp.float32) + b1, 0.0
    ).astype(jnp.bfloat16)
    ref = jnp.maximum(
        jnp.dot(ref, w2, preferred_element_type=jnp.float32) + b2, 0.0
    ).astype(jnp.bfloat16)
    ref = jnp.maximum(
        jnp.dot(ref, w3, preferred_element_type=jnp.float32) + b3, 0.0
    )

    assert out.shape == (B, H3)
    assert out.dtype == jnp.float32
    assert jnp.allclose(out, ref, atol=1e-2, rtol=1e-2), (
        float(jnp.max(jnp.abs(out - ref)))
    )

    print("KERNEL_OK")
</pallas_src>

<mosaic_0001>
module attributes {stable_mosaic.version = 11 : i64} {
  func.func @_mlp_kernel(%arg0: i32, %arg1: memref<16x784xbf16, #tpu.memory_space<vmem>>, %arg2: memref<784x512xbf16, #tpu.memory_space<vmem>>, %arg3: memref<1x512xf32, #tpu.memory_space<vmem>>, %arg4: memref<512x256xbf16, #tpu.memory_space<vmem>>, %arg5: memref<1x256xf32, #tpu.memory_space<vmem>>, %arg6: memref<256x128xbf16, #tpu.memory_space<vmem>>, %arg7: memref<1x128xf32, #tpu.memory_space<vmem>>, %arg8: memref<16x128xf32, #tpu.memory_space<vmem>>) attributes {dimension_semantics = [#tpu.dimension_semantics<parallel>], iteration_bounds = array<i64: 1>, scalar_prefetch = 0 : i64, scratch_operands = 0 : i64, tpu.core_type = #tpu.core_type<tc>, window_params = [{transform_indices = @transform_0, window_bounds = array<i64: 16, 784>}, {pipeline_mode = #tpu.pipeline_mode<synchronous>, transform_indices = @transform_1, window_bounds = array<i64: 784, 512>}, {pipeline_mode = #tpu.pipeline_mode<synchronous>, transform_indices = @transform_2, window_bounds = array<i64: 1, 512>}, {pipeline_mode = #tpu.pipeline_mode<synchronous>, transform_indices = @transform_3, window_bounds = array<i64: 512, 256>}, {pipeline_mode = #tpu.pipeline_mode<synchronous>, transform_indices = @transform_4, window_bounds = array<i64: 1, 256>}, {pipeline_mode = #tpu.pipeline_mode<synchronous>, transform_indices = @transform_5, window_bounds = array<i64: 256, 128>}, {pipeline_mode = #tpu.pipeline_mode<synchronous>, transform_indices = @transform_6, window_bounds = array<i64: 1, 128>}, {transform_indices = @transform_7, window_bounds = array<i64: 16, 128>}]} {
    %c0 = arith.constant 0 : index
    %c0_0 = arith.constant 0 : index
    %0 = vector.load %arg1[%c0, %c0_0] : memref<16x784xbf16, #tpu.memory_space<vmem>>, vector<16x784xbf16>
    %c0_1 = arith.constant 0 : index
    %c0_2 = arith.constant 0 : index
    %1 = vector.load %arg2[%c0_1, %c0_2] : memref<784x512xbf16, #tpu.memory_space<vmem>>, vector<784x512xbf16>
    %cst = arith.constant dense<0.000000e+00> : vector<16x512xf32>
    %2 = tpu.matmul %0, %1, %cst {dimension_numbers = #tpu.dot_dimension_numbers<[1], [0], [0], [1], [0, 0, 1, 1], [], []>} : vector<16x784xbf16>, vector<784x512xbf16>, vector<16x512xf32> -> vector<16x512xf32>
    %c0_3 = arith.constant 0 : index
    %c0_4 = arith.constant 0 : index
    %3 = vector.load %arg3[%c0_3, %c0_4] : memref<1x512xf32, #tpu.memory_space<vmem>>, vector<1x512xf32>
    %4 = vector.broadcast %3 : vector<1x512xf32> to vector<16x512xf32>
    %5 = arith.addf %2, %4 : vector<16x512xf32>
    %cst_5 = arith.constant 0.000000e+00 : f32
    %6 = vector.broadcast %cst_5 : f32 to vector<16x512xf32>
    %7 = arith.maximumf %5, %6 : vector<16x512xf32>
    %8 = arith.truncf %7 : vector<16x512xf32> to vector<16x512xbf16>
    %c0_6 = arith.constant 0 : index
    %c0_7 = arith.constant 0 : index
    %9 = vector.load %arg4[%c0_6, %c0_7] : memref<512x256xbf16, #tpu.memory_space<vmem>>, vector<512x256xbf16>
    %cst_8 = arith.constant dense<0.000000e+00> : vector<16x256xf32>
    %10 = tpu.matmul %8, %9, %cst_8 {dimension_numbers = #tpu.dot_dimension_numbers<[1], [0], [0], [1], [0, 0, 1, 1], [], []>} : vector<16x512xbf16>, vector<512x256xbf16>, vector<16x256xf32> -> vector<16x256xf32>
    %c0_9 = arith.constant 0 : index
    %c0_10 = arith.constant 0 : index
    %11 = vector.load %arg5[%c0_9, %c0_10] : memref<1x256xf32, #tpu.memory_space<vmem>>, vector<1x256xf32>
    %12 = vector.broadcast %11 : vector<1x256xf32> to vector<16x256xf32>
    %13 = arith.addf %10, %12 : vector<16x256xf32>
    %cst_11 = arith.constant 0.000000e+00 : f32
    %14 = vector.broadcast %cst_11 : f32 to vector<16x256xf32>
    %15 = arith.maximumf %13, %14 : vector<16x256xf32>
    %16 = arith.truncf %15 : vector<16x256xf32> to vector<16x256xbf16>
    %c0_12 = arith.constant 0 : index
    %c0_13 = arith.constant 0 : index
    %17 = vector.load %arg6[%c0_12, %c0_13] : memref<256x128xbf16, #tpu.memory_space<vmem>>, vector<256x128xbf16>
    %cst_14 = arith.constant dense<0.000000e+00> : vector<16x128xf32>
    %18 = tpu.matmul %16, %17, %cst_14 {dimension_numbers = #tpu.dot_dimension_numbers<[1], [0], [0], [1], [0, 0, 1, 1], [], []>} : vector<16x256xbf16>, vector<256x128xbf16>, vector<16x128xf32> -> vector<16x128xf32>
    %c0_15 = arith.constant 0 : index
    %c0_16 = arith.constant 0 : index
    %19 = vector.load %arg7[%c0_15, %c0_16] : memref<1x128xf32, #tpu.memory_space<vmem>>, vector<1x128xf32>
    %20 = vector.broadcast %19 : vector<1x128xf32> to vector<16x128xf32>
    %21 = arith.addf %18, %20 : vector<16x128xf32>
    %cst_17 = arith.constant 0.000000e+00 : f32
    %22 = vector.broadcast %cst_17 : f32 to vector<16x128xf32>
    %23 = arith.maximumf %21, %22 : vector<16x128xf32>
    %c0_18 = arith.constant 0 : index
    %c0_19 = arith.constant 0 : index
    %24 = vector.load %arg8[%c0_18, %c0_19] : memref<16x128xf32, #tpu.memory_space<vmem>>, vector<16x128xf32>
    tpu.vector_store %arg8[%c0_18, %c0_19], %23 {strides = array<i32>} : memref<16x128xf32, #tpu.memory_space<vmem>>, vector<16x128xf32>,
    return
  }
  func.func @transform_0(%arg0: i32) -> (i32, i32) {
    %c0_i32 = arith.constant 0 : i32
    %c0_i32_0 = arith.constant 0 : i32
    return %arg0, %c0_i32 : i32, i32
  }
  func.func @transform_1(%arg0: i32) -> (i32, i32) {
    %c0_i32 = arith.constant 0 : i32
    %c0_i32_0 = arith.constant 0 : i32
    %c0_i32_1 = arith.constant 0 : i32
    return %c0_i32, %c0_i32_0 : i32, i32
  }
  func.func @transform_2(%arg0: i32) -> (i32, i32) {
    %c0_i32 = arith.constant 0 : i32
    %c0_i32_0 = arith.constant 0 : i32
    %c0_i32_1 = arith.constant 0 : i32
    return %c0_i32, %c0_i32_0 : i32, i32
  }
  func.func @transform_3(%arg0: i32) -> (i32, i32) {
    %c0_i32 = arith.constant 0 : i32
    %c0_i32_0 = arith.constant 0 : i32
    %c0_i32_1 = arith.constant 0 : i32
    return %c0_i32, %c0_i32_0 : i32, i32
  }
  func.func @transform_4(%arg0: i32) -> (i32, i32) {
    %c0_i32 = arith.constant 0 : i32
    %c0_i32_0 = arith.constant 0 : i32
    %c0_i32_1 = arith.constant 0 : i32
    return %c0_i32, %c0_i32_0 : i32, i32
  }
  func.func @transform_5(%arg0: i32) -> (i32, i32) {
    %c0_i32 = arith.constant 0 : i32
    %c0_i32_0 = arith.constant 0 : i32
    %c0_i32_1 = arith.constant 0 : i32
    return %c0_i32, %c0_i32_0 : i32, i32
  }
  func.func @transform_6(%arg0: i32) -> (i32, i32) {
    %c0_i32 = arith.constant 0 : i32
    %c0_i32_0 = arith.constant 0 : i32
    %c0_i32_1 = arith.constant 0 : i32
    return %c0_i32, %c0_i32_0 : i32, i32
  }
  func.func @transform_7(%arg0: i32) -> (i32, i32) {
    %c0_i32 = arith.constant 0 : i32
    %c0_i32_0 = arith.constant 0 : i32
    return %arg0, %c0_i32 : i32, i32
  }
}

</mosaic_0001>

<bundles_post_ra>
// kernel: tpu_custom_call.1
= control target key start
LH: loop header
LB: loop body
LE: loop exit
PB: predicated region body
PF: predicated region fallthrough
CT: control target
= control target key end

     0   :  { %12 = vsyncpa [#allocation3], 0  ;;  %s3448_s0 = inlined_call_operand.hbm [shape: bf16[16,784], index: 0, kind: input, shape index: {}]   ;;  %s3449_s1 = inlined_call_operand.hbm [shape: bf16[784,512], index: 1, kind: input, shape index: {}]   ;;  %s3450_s2 = inlined_call_operand.vmem [shape: f32[1,512], index: 2, kind: input, shape index: {}]   ;;  %s3451_s3 = inlined_call_operand.hbm [shape: bf16[512,256], index: 3, kind: input, shape index: {}]   ;;  %s3452_s4 = inlined_call_operand.vmem [shape: f32[1,256], index: 4, kind: input, shape index: {}]   ;;  %s3453_s5 = inlined_call_operand.hbm [shape: bf16[256,128], index: 5, kind: input, shape index: {}]   ;;  %s3454_s6 = inlined_call_operand.vmem [shape: f32[1,128], index: 6, kind: input, shape index: {}]   ;;  %s3455_s7 = inlined_call_operand.hbm [shape: f32[16,128], index: 7, kind: output, shape index: {}]  }
   0x1   :  { %13 = vsyncpa [#allocation6], 0 }
   0x2   :  { %14 = vsyncpa [#allocation9], 0 }
   0x3   :  { %15 = vsyncpa [#allocation4], 0  ;;  %s3267_s24 = smov [#allocation5]   ;;  %s3149_s28 = scalar_lea.hbm %s3449_s1, 25088 }
   0x4   :  { %s33_s25 = sshll.u32 %s3267_s24, 4  ;;  %p3150_p0 = scmp.ne.s32.totalorder %s3449_s1, %s3149_s28  ;;  %s34_s25 = int_to_ptr.vmem [resolvable:$true] %s33_s25 }
   0x5   :  { %p3153_p1 = scmp.lt.u32.totalorder %s3149_s28, %s3449_s1 }
   0x7   :  { %p3155_p2 = pnand %p3153_p1, %p3150_p0 }
   0x9   :  { %3158 = shalt.err (!%p3155_p2)
}
   0xa   :  { %s3159_s10 = scalar_lea.vmem %s34_s25, 25088  ;;  %p3164_p4 = scmp.lt.s32.totalorder %s34_s25, %s34_s25 }
   0xb   :  { %p3160_p3 = scmp.ne.s32.totalorder %s34_s25, %s3159_s10  ;;  %p3165_p5 = scmp.lt.s32.totalorder %s3159_s10, %s3159_s10 }
   0xd   :  { %p3166_p6 = por %p3165_p5, %p3164_p4 }
   0xf   :  { %p3167_p7 = pnand %p3166_p6, %p3160_p3 }
  0x11   :  { %3170 = shalt.err (!%p3167_p7)
}
  0x12   :  { %s3268_s11 = smov 256   ;;  %s3269_s12 = smov 16  }
  0x13   :  { %39 = dma.hbm_to_vmem [thread:$0]  %s3449_s1, 25088, %s34_s25, [#allocation6], %s3268_s11, %s3268_s11, %s3269_s12  }
  0x14   :  { %s3270_s15 = smov [#allocation2]   ;;  %s3171_s19 = scalar_lea.hbm %s3448_s0, 896 }
  0x15   :  { %s21_s16 = sshll.u32 %s3270_s15, 4  ;;  %p3172_p8 = scmp.ne.s32.totalorder %s3448_s0, %s3171_s19  ;;  %s22_s16 = int_to_ptr.vmem [resolvable:$true] %s21_s16 }
  0x16   :  { %p3175_p9 = scmp.lt.u32.totalorder %s3171_s19, %s3448_s0 }
  0x18   :  { %p3177_p10 = pnand %p3175_p9, %p3172_p8 }
  0x1a   :  { %3180 = shalt.err (!%p3177_p10)
}
  0x1b   :  { %s3181_s24 = scalar_lea.vmem %s22_s16, 896  ;;  %p3186_p12 = scmp.lt.s32.totalorder %s22_s16, %s22_s16 }
  0x1c   :  { %p3182_p11 = scmp.ne.s32.totalorder %s22_s16, %s3181_s24  ;;  %p3187_p13 = scmp.lt.s32.totalorder %s3181_s24, %s3181_s24 }
  0x1e   :  { %p3188_p0 = por %p3187_p13, %p3186_p12 }
  0x20   :  { %p3189_p1 = pnand %p3188_p0, %p3182_p11 }
  0x22   :  { %3192 = shalt.err (!%p3189_p1)
}
  0x23   :  { %s3271_s1 = smov 448   ;;  %s3272_s25 = smov 28  }
  0x24   :  { %27 = dma.hbm_to_vmem [thread:$0]  %s3448_s0, 896, %s22_s16, [#allocation3], %s3271_s1, %s3271_s1, %s3272_s25  }
  0x25   :  { %s3273_s28 = smov [#allocation7]   ;;  %s3193_s9 = scalar_lea.hbm %s3451_s3, 8192 }
  0x26   :  { %s47_s29 = sshll.u32 %s3273_s28, 4  ;;  %p3194_p2 = scmp.ne.s32.totalorder %s3451_s3, %s3193_s9  ;;  %s48_s29 = int_to_ptr.vmem [resolvable:$true] %s47_s29 }
  0x27   :  { %p3197_p3 = scmp.lt.u32.totalorder %s3193_s9, %s3451_s3 }
  0x29   :  { %p3199_p4 = pnand %p3197_p3, %p3194_p2 }
  0x2b   :  { %3202 = shalt.err (!%p3199_p4)
}
  0x2c   :  { %s3203_s14 = scalar_lea.vmem %s48_s29, 8192  ;;  %p3208_p6 = scmp.lt.s32.totalorder %s48_s29, %s48_s29 }
  0x2d   :  { %p3204_p5 = scmp.ne.s32.totalorder %s48_s29, %s3203_s14  ;;  %p3209_p7 = scmp.lt.s32.totalorder %s3203_s14, %s3203_s14 }
  0x2f   :  { %p3210_p8 = por %p3209_p7, %p3208_p6 }
  0x31   :  { %p3211_p9 = pnand %p3210_p8, %p3204_p5 }
  0x33   :  { %3214 = shalt.err (!%p3211_p9)
}
  0x34   :  { %s3274_s0 = smov 128   ;;  %s3275_s15 = smov 8  }
  0x35   :  { %53 = dma.hbm_to_vmem [thread:$0]  %s3451_s3, 8192, %s48_s29, [#allocation6], %s3274_s0, %s3274_s0, %s3275_s15  }
  0x36   :  { %s3276_s18 = smov [#allocation8]   ;;  %s3215_s22 = scalar_lea.hbm %s3453_s5, 2048 }
  0x37   :  { %s61_s19 = sshll.u32 %s3276_s18, 4  ;;  %p3216_p10 = scmp.ne.s32.totalorder %s3453_s5, %s3215_s22  ;;  %s62_s19 = int_to_ptr.vmem [resolvable:$true] %s61_s19 }
  0x38   :  { %p3219_p11 = scmp.lt.u32.totalorder %s3215_s22, %s3453_s5 }
  0x3a   :  { %p3221_p12 = pnand %p3219_p11, %p3216_p10 }
  0x3c   :  { %3224 = shalt.err (!%p3221_p12)
}
  0x3d   :  { %s3225_s26 = scalar_lea.vmem %s62_s19, 2048  ;;  %p3230_p0 = scmp.lt.s32.totalorder %s62_s19, %s62_s19 }
  0x3e   :  { %p3226_p13 = scmp.ne.s32.totalorder %s62_s19, %s3225_s26  ;;  %p3231_p1 = scmp.lt.s32.totalorder %s3225_s26, %s3225_s26 }
  0x40   :  { %p3232_p2 = por %p3231_p1, %p3230_p0 }
  0x42   :  { %p3233_p3 = pnand %p3232_p2, %p3226_p13 }
  0x44   :  { %3236 = shalt.err (!%p3233_p3)
}
  0x45   :  { %s3277_s3 = smov 64   ;;  %s3278_s27 = smov 4  }
  0x46   :  { %67 = dma.hbm_to_vmem [thread:$0]  %s3453_s5, 2048, %s62_s19, [#allocation9], %s3277_s3, %s3277_s3, %s3278_s27  }
  0x47   :  { %3259 = dma.done.wait [#allocation3], 896  }
  0x48   :  { %3260 = vsyncadd [#allocation3], 4294966400 }
  0x49   :  { %3261 = dma.done.wait [#allocation6], 33280  }
  0x4a   :  { %3262 = vsyncadd [#allocation6], 4294934016 }
  0x4b   :  { %3263 = dma.done.wait [#allocation9], 2048  }
  0x4c   :  { %3264 = vsyncadd [#allocation9], 4294965248  ;;  %v2733_v0 = vld [vmem:[#allocation5 + $0x4] ss:$16 sps:$4 sm:$0xff]   ;;  %v2737_v2 = vld [vmem:[#allocation5] ss:$16 sps:$4 sm:$0xff]  }
  0x4d   :  { %v2735_v1 = vld [vmem:[#allocation5 + $0x204] ss:$16 sps:$4 sm:$0xff]   ;;  %1328 = vmatprep.subr.bf16.mxu1 %v2733_v0  ;;  %v2738_v3 = vld [vmem:[#allocation5 + $0x200] ss:$16 sps:$4 sm:$0xff]   ;;  %v2831_v49 = vld [vmem:[#allocation2 + $0x4] ss:$28 sps:$4 sm:$0xff]  }
  0x4e   :  { %1371 = vmatprep.subr.bf16.mxu0 %v2735_v1  ;;  %v2739_v4 = vld [vmem:[#allocation5 + $0x24] ss:$16 sps:$4 sm:$0xff]   ;;  %1329 = vmatpush1.bf16.msra.mxu1 %v2737_v2  ;;  %v2743_v6 = vld [vmem:[#allocation5 + $0x20] ss:$16 sps:$4 sm:$0xff]   ;;  %vm1324_vm0 = vcmask 130048   ;;  %s3280_s10 = smov [#allocation10]  }
  0x4f   :  { %1372 = vmatpush1.bf16.msra.mxu0 %v2738_v3  ;;  %v2741_v5 = vld [vmem:[#allocation5 + $0x224] ss:$16 sps:$4 sm:$0xff]   ;;  %1330 = vmatprep.subr.bf16.mxu1 %v2739_v4  ;;  %v2744_v7 = vld [vmem:[#allocation5 + $0x220] ss:$16 sps:$4 sm:$0xff]   ;;  %v2840_v3 = vld [vmem:[#allocation5 + $0xc] ss:$16 sps:$4 sm:$0xff]  }
  0x50   :  { %1373 = vmatprep.subr.bf16.mxu0 %v2741_v5  ;;  %v2745_v8 = vld [vmem:[#allocation5 + $0x44] ss:$16 sps:$4 sm:$0xff]   ;;  %v2749_v10 = vld [vmem:[#allocation5 + $0x40] ss:$16 sps:$4 sm:$0xff]   ;;  %1360 = vmatprep.mubr.bf16.mxu1 %v2831_v49  ;;  %s2357_s11 = sshll.u32 %s3280_s10, 4  ;;  %s2358_s11 = int_to_ptr.vmem [resolvable:$true] %s2357_s11 }
  0x51   :  { %v2747_v9 = vld [vmem:[#allocation5 + $0x244] ss:$16 sps:$4 sm:$0xff]   ;;  %v2750_v11 = vld [vmem:[#allocation5 + $0x240] ss:$16 sps:$4 sm:$0xff]   ;;  %s3237_s12 = scalar_lea.vmem %s2358_s11, 256  ;;  %p3242_p5 = scmp.lt.s32.totalorder %s2358_s11, %s2358_s11 }
  0x52   :  { %1331 = vmatpush1.bf16.msra.mxu1 %v2743_v6  ;;  %v2751_v12 = vld [vmem:[#allocation5 + $0x64] ss:$16 sps:$4 sm:$0xff]   ;;  %v2755_v14 = vld [vmem:[#allocation5 + $0x60] ss:$16 sps:$4 sm:$0xff]   ;;  %p3238_p4 = scmp.ne.s32.totalorder %s2358_s11, %s3237_s12  ;;  %p3243_p6 = scmp.lt.s32.totalorder %s3237_s12, %s3237_s12 }
  0x53   :  { %1374 = vmatpush1.bf16.msra.mxu0 %v2744_v7  ;;  %1332 = vmatprep.subr.bf16.mxu1 %v2745_v8  ;;  %v2753_v13 = vld [vmem:[#allocation5 + $0x264] ss:$16 sps:$4 sm:$0xff]   ;;  %v2756_v15 = vld [vmem:[#allocation5 + $0x260] ss:$16 sps:$4 sm:$0xff]   ;;  %v2838_v7 = vld [vmem:[#allocation5 + $0x8] ss:$16 sps:$4 sm:$0xff]  }
  0x54   :  { %1375 = vmatprep.subr.bf16.mxu0 %v2747_v9  ;;  %v2757_v16 = vld [vmem:[#allocation5 + $0x84] ss:$16 sps:$4 sm:$0xff]   ;;  %v2761_v18 = vld [vmem:[#allocation5 + $0x80] ss:$16 sps:$4 sm:$0xff]   ;;  %v2846_v9 = vld [vmem:[#allocation5 + $0x2c] ss:$16 sps:$4 sm:$0xff]   ;;  %p3244_p7 = por %p3243_p6, %p3242_p5 }
  0x55   :  { %v2759_v17 = vld [vmem:[#allocation5 + $0x284] ss:$16 sps:$4 sm:$0xff]   ;;  %v2762_v19 = vld [vmem:[#allocation5 + $0x280] ss:$16 sps:$4 sm:$0xff]  }
  0x56   :  { %1333 = vmatpush1.bf16.msra.mxu1 %v2749_v10  ;;  %v2763_v20 = vld [vmem:[#allocation5 + $0xa4] ss:$16 sps:$4 sm:$0xff]   ;;  %v2767_v22 = vld [vmem:[#allocation5 + $0xa0] ss:$16 sps:$4 sm:$0xff]   ;;  %p3245_p8 = pnand %p3244_p7, %p3238_p4 }
  0x57   :  { %1376 = vmatpush1.bf16.msra.mxu0 %v2750_v11  ;;  %1334 = vmatprep.subr.bf16.mxu1 %v2751_v12  ;;  %v2765_v21 = vld [vmem:[#allocation5 + $0x2a4] ss:$16 sps:$4 sm:$0xff]   ;;  %v2768_v23 = vld [vmem:[#allocation5 + $0x2a0] ss:$16 sps:$4 sm:$0xff]   ;;  %v2844_v11 = vld [vmem:[#allocation5 + $0x28] ss:$16 sps:$4 sm:$0xff]  }
  0x58   :  { %1377 = vmatprep.subr.bf16.mxu0 %v2753_v13  ;;  %v2769_v24 = vld [vmem:[#allocation5 + $0xc4] ss:$16 sps:$4 sm:$0xff]   ;;  %v2773_v26 = vld [vmem:[#allocation5 + $0xc0] ss:$16 sps:$4 sm:$0xff]   ;;  %v2852_v13 = vld [vmem:[#allocation5 + $0x4c] ss:$16 sps:$4 sm:$0xff]  }
  0x59   :  { %v2771_v25 = vld [vmem:[#allocation5 + $0x2c4] ss:$16 sps:$4 sm:$0xff]   ;;  %v2774_v27 = vld [vmem:[#allocation5 + $0x2c0] ss:$16 sps:$4 sm:$0xff]  }
  0x5a   :  { %1335 = vmatpush1.bf16.msra.mxu1 %v2755_v14  ;;  %v2775_v28 = vld [vmem:[#allocation5 + $0xe4] ss:$16 sps:$4 sm:$0xff]   ;;  %v2779_v30 = vld [vmem:[#allocation5 + $0xe0] ss:$16 sps:$4 sm:$0xff]  }
  0x5b   :  { %1378 = vmatpush1.bf16.msra.mxu0 %v2756_v15  ;;  %1336 = vmatprep.subr.bf16.mxu1 %v2757_v16  ;;  %v2777_v29 = vld [vmem:[#allocation5 + $0x2e4] ss:$16 sps:$4 sm:$0xff]   ;;  %v2780_v31 = vld [vmem:[#allocation5 + $0x2e0] ss:$16 sps:$4 sm:$0xff]   ;;  %v2850_v15 = vld [vmem:[#allocation5 + $0x48] ss:$16 sps:$4 sm:$0xff]  }
  0x5c   :  { %1379 = vmatprep.subr.bf16.mxu0 %v2759_v17  ;;  %v2781_v32 = vld [vmem:[#allocation5 + $0x104] ss:$16 sps:$4 sm:$0xff]   ;;  %v2785_v34 = vld [vmem:[#allocation5 + $0x100] ss:$16 sps:$4 sm:$0xff]   ;;  %v2858_v17 = vld [vmem:[#allocation5 + $0x6c] ss:$16 sps:$4 sm:$0xff]  }
  0x5d   :  { %v2783_v33 = vld [vmem:[#allocation5 + $0x304] ss:$16 sps:$4 sm:$0xff]   ;;  %v2786_v35 = vld [vmem:[#allocation5 + $0x300] ss:$16 sps:$4 sm:$0xff]  }
  0x5e   :  { %1337 = vmatpush1.bf16.msra.mxu1 %v2761_v18  ;;  %v2787_v36 = vld [vmem:[#allocation5 + $0x124] ss:$16 sps:$4 sm:$0xff]   ;;  %v2791_v38 = vld [vmem:[#allocation5 + $0x120] ss:$16 sps:$4 sm:$0xff]  }
  0x5f   :  { %1380 = vmatpush1.bf16.msra.mxu0 %v2762_v19  ;;  %1338 = vmatprep.subr.bf16.mxu1 %v2763_v20  ;;  %v2789_v37 = vld [vmem:[#allocation5 + $0x324] ss:$16 sps:$4 sm:$0xff]   ;;  %v2792_v39 = vld [vmem:[#allocation5 + $0x320] ss:$16 sps:$4 sm:$0xff]   ;;  %v2856_v19 = vld [vmem:[#allocation5 + $0x68] ss:$16 sps:$4 sm:$0xff]  }
  0x60   :  { %1381 = vmatprep.subr.bf16.mxu0 %v2765_v21  ;;  %v2793_v40 = vld [vmem:[#allocation5 + $0x144] ss:$16 sps:$4 sm:$0xff]   ;;  %v2797_v42 = vld [vmem:[#allocation5 + $0x140] ss:$16 sps:$4 sm:$0xff]   ;;  %v2864_v21 = vld [vmem:[#allocation5 + $0x8c] ss:$16 sps:$4 sm:$0xff]  }
  0x61   :  { %v2795_v41 = vld [vmem:[#allocation5 + $0x344] ss:$16 sps:$4 sm:$0xff]   ;;  %v2798_v43 = vld [vmem:[#allocation5 + $0x340] ss:$16 sps:$4 sm:$0xff]  }
  0x62   :  { %1339 = vmatpush1.bf16.msra.mxu1 %v2767_v22  ;;  %v2799_v44 = vld [vmem:[#allocation5 + $0x164] ss:$16 sps:$4 sm:$0xff]   ;;  %v2803_v46 = vld [vmem:[#allocation5 + $0x160] ss:$16 sps:$4 sm:$0xff]  }
  0x63   :  { %1382 = vmatpush1.bf16.msra.mxu0 %v2768_v23  ;;  %1340 = vmatprep.subr.bf16.mxu1 %v2769_v24  ;;  %v2801_v45 = vld [vmem:[#allocation5 + $0x364] ss:$16 sps:$4 sm:$0xff]   ;;  %v2804_v47 = vld [vmem:[#allocation5 + $0x360] ss:$16 sps:$4 sm:$0xff]   ;;  %v2862_v23 = vld [vmem:[#allocation5 + $0x88] ss:$16 sps:$4 sm:$0xff]  }
  0x64   :  { %1383 = vmatprep.subr.bf16.mxu0 %v2771_v25  ;;  %v2805_v48 = vld [vmem:[#allocation5 + $0x184] ss:$16 sps:$4 sm:$0xff]   ;;  %v2809_v52 = vld [vmem:[#allocation5 + $0x180] ss:$16 sps:$4 sm:$0xff]   ;;  %v2870_v25 = vld [vmem:[#allocation5 + $0xac] ss:$16 sps:$4 sm:$0xff]  }
  0x65   :  { %v2807_v50 = vld [vmem:[#allocation5 + $0x384] ss:$16 sps:$4 sm:$0xff]   ;;  %v2810_v53 = vld [vmem:[#allocation5 + $0x380] ss:$16 sps:$4 sm:$0xff]  }
  0x66   :  { %1341 = vmatpush1.bf16.msra.mxu1 %v2773_v26  ;;  %v3372_v51 = vld [vmem:[#allocation2 + $0xc] ss:$28 sps:$4 sm:$0xff]   ;;  %v3375_v4 = vld [vmem:[#allocation2] ss:$28 sps:$4 sm:$0xff]  }
  0x67   :  { %1384 = vmatpush1.bf16.msra.mxu0 %v2774_v27  ;;  %1342 = vmatprep.subr.bf16.mxu1 %v2775_v28  ;;  %v2811_v54 = vld [vmem:[#allocation5 + $0x1a4] ss:$16 sps:$4 sm:$0xff]   ;;  %v2815_v56 = vld [vmem:[#allocation5 + $0x1a0] ss:$16 sps:$4 sm:$0xff]   ;;  %v2868_v27 = vld [vmem:[#allocation5 + $0xa8] ss:$16 sps:$4 sm:$0xff]  }
  0x68   :  { %1385 = vmatprep.subr.bf16.mxu0 %v2777_v29  ;;  %1403 = vmatprep.mubr.bf16.mxu0 %v3372_v51  ;;  %v2813_v55 = vld [vmem:[#allocation5 + $0x3a4] ss:$16 sps:$4 sm:$0xff]   ;;  %v2816_v57 = vld [vmem:[#allocation5 + $0x3a0] ss:$16 sps:$4 sm:$0xff]   ;;  %v2876_v29 = vld [vmem:[#allocation5 + $0xcc] ss:$16 sps:$4 sm:$0xff]  }
  0x69   :  { %v2817_v58 = vld [vmem:[#allocation5 + $0x1c4] ss:$16 sps:$4 sm:$0xff]   ;;  %v2821_v60 = vld [vmem:[#allocation5 + $0x1c0] ss:$16 sps:$4 sm:$0xff]  }
  0x6a   :  { %1343 = vmatpush1.bf16.msra.mxu1 %v2779_v30  ;;  %v2819_v59 = vld [vmem:[#allocation5 + $0x3c4] ss:$16 sps:$4 sm:$0xff]   ;;  %v2822_v61 = vld [vmem:[#allocation5 + $0x3c0] ss:$16 sps:$4 sm:$0xff]  }
  0x6b   :  { %1386 = vmatpush1.bf16.msra.mxu0 %v2780_v31  ;;  %1344 = vmatprep.subr.bf16.mxu1 %v2781_v32  ;;  %v2823_v62 = vld [vmem:[#allocation5 + $0x1e4] ss:$16 sps:$4 sm:$0xff]   ;;  %v2827_v0 = vld [vmem:[#allocation5 + $0x1e0] ss:$16 sps:$4 sm:$0xff]   ;;  %v2874_v31 = vld [vmem:[#allocation5 + $0xc8] ss:$16 sps:$4 sm:$0xff]  }
  0x6c   :  { %1387 = vmatprep.subr.bf16.mxu0 %v2783_v33  ;;  %v2825_v63 = vld [vmem:[#allocation5 + $0x3e4] ss:$16 sps:$4 sm:$0xff]   ;;  %v2828_v1 = vld [vmem:[#allocation5 + $0x3e0] ss:$16 sps:$4 sm:$0xff]   ;;  %v2882_v33 = vld [vmem:[#allocation5 + $0xec] ss:$16 sps:$4 sm:$0xff]  }
  0x6d   :  { %v2837_v2 = vld [vmem:[#allocation5 + $0x404] ss:$16 sps:$4 sm:$0xff]   ;;  %v3377_v5 = vld [vmem:[#allocation2 + $0x8] ss:$28 sps:$4 sm:$0xff]  }
  0x6e   :  { %1345 = vmatpush1.bf16.msra.mxu1 %v2785_v34  ;;  %v2835_v6 = vld [vmem:[#allocation5 + $0x400] ss:$16 sps:$4 sm:$0xff]   ;;  %v2843_v8 = vld [vmem:[#allocation5 + $0x424] ss:$16 sps:$4 sm:$0xff]   ;;  %v3381_v34 = vld [vmem:[#allocation2 + $0x14] ss:$28 sps:$4 sm:$0xff]  }
  0x6f   :  { %1388 = vmatpush1.bf16.msra.mxu0 %v2786_v35  ;;  %1346 = vmatprep.subr.bf16.mxu1 %v2787_v36  ;;  %v2841_v10 = vld [vmem:[#allocation5 + $0x420] ss:$16 sps:$4 sm:$0xff]   ;;  %v2849_v12 = vld [vmem:[#allocation5 + $0x444] ss:$16 sps:$4 sm:$0xff]   ;;  %v2880_v36 = vld [vmem:[#allocation5 + $0xe8] ss:$16 sps:$4 sm:$0xff]  }
  0x70   :  { %1389 = vmatprep.subr.bf16.mxu0 %v2789_v37  ;;  %v2847_v14 = vld [vmem:[#allocation5 + $0x440] ss:$16 sps:$4 sm:$0xff]   ;;  %v2855_v16 = vld [vmem:[#allocation5 + $0x464] ss:$16 sps:$4 sm:$0xff]  }
  0x71   :  { %v2853_v18 = vld [vmem:[#allocation5 + $0x460] ss:$16 sps:$4 sm:$0xff]   ;;  %v2861_v20 = vld [vmem:[#allocation5 + $0x484] ss:$16 sps:$4 sm:$0xff]  }
  0x72   :  { %1347 = vmatpush1.bf16.msra.mxu1 %v2791_v38  ;;  %v2859_v22 = vld [vmem:[#allocation5 + $0x480] ss:$16 sps:$4 sm:$0xff]   ;;  %v2867_v24 = vld [vmem:[#allocation5 + $0x4a4] ss:$16 sps:$4 sm:$0xff]   ;;  %v2888_v38 = vld [vmem:[#allocation5 + $0x10c] ss:$16 sps:$4 sm:$0xff]  }
  0x73   :  { %1390 = vmatpush1.bf16.msra.mxu0 %v2792_v39  ;;  %1348 = vmatprep.subr.bf16.mxu1 %v2793_v40  ;;  %v2865_v26 = vld [vmem:[#allocation5 + $0x4a0] ss:$16 sps:$4 sm:$0xff]   ;;  %v2873_v28 = vld [vmem:[#allocation5 + $0x4c4] ss:$16 sps:$4 sm:$0xff]   ;;  %v2886_v40 = vld [vmem:[#allocation5 + $0x108] ss:$16 sps:$4 sm:$0xff]  }
  0x74   :  { %1391 = vmatprep.subr.bf16.mxu0 %v2795_v41  ;;  %v2871_v30 = vld [vmem:[#allocation5 + $0x4c0] ss:$16 sps:$4 sm:$0xff]   ;;  %v2879_v32 = vld [vmem:[#allocation5 + $0x4e4] ss:$16 sps:$4 sm:$0xff]  }
  0x75   :  { %v2877_v35 = vld [vmem:[#allocation5 + $0x4e0] ss:$16 sps:$4 sm:$0xff]   ;;  %v2885_v37 = vld [vmem:[#allocation5 + $0x504] ss:$16 sps:$4 sm:$0xff]  }
  0x76   :  { %1349 = vmatpush1.bf16.msra.mxu1 %v2797_v42  ;;  %v2883_v39 = vld [vmem:[#allocation5 + $0x500] ss:$16 sps:$4 sm:$0xff]   ;;  %v2891_v41 = vld [vmem:[#allocation5 + $0x524] ss:$16 sps:$4 sm:$0xff]   ;;  %v2894_v42 = vld [vmem:[#allocation5 + $0x12c] ss:$16 sps:$4 sm:$0xff]  }
  0x77   :  { %1392 = vmatpush1.bf16.msra.mxu0 %v2798_v43  ;;  %1350 = vmatprep.subr.bf16.mxu1 %v2799_v44  ;;  %v2889_v43 = vld [vmem:[#allocation5 + $0x520] ss:$16 sps:$4 sm:$0xff]   ;;  %v2892_v44 = vld [vmem:[#allocation5 + $0x128] ss:$16 sps:$4 sm:$0xff]  }
  0x78   :  { %1393 = vmatprep.subr.bf16.mxu0 %v2801_v45  ;;  %v2897_v45 = vld [vmem:[#allocation5 + $0x544] ss:$16 sps:$4 sm:$0xff]  }
  0x7a   :  { %1351 = vmatpush1.bf16.msra.mxu1 %v2803_v46  ;;  %v2900_v46 = vld [vmem:[#allocation5 + $0x14c] ss:$16 sps:$4 sm:$0xff]  }
  0x7b   :  { %1394 = vmatpush1.bf16.msra.mxu0 %v2804_v47  ;;  %1352 = vmatprep.subr.bf16.mxu1 %v2805_v48  ;;  %v2895_v47 = vld [vmem:[#allocation5 + $0x540] ss:$16 sps:$4 sm:$0xff]   ;;  %v2898_v48 = vld [vmem:[#allocation5 + $0x148] ss:$16 sps:$4 sm:$0xff]  }
  0x7c   :  { %1395 = vmatprep.subr.bf16.mxu0 %v2807_v50  ;;  %v2906_v50 = vld [vmem:[#allocation5 + $0x16c] ss:$16 sps:$4 sm:$0xff]  }
  0x7e   :  { %1353 = vmatpush1.bf16.msra.mxu1 %v2809_v52  ;;  %v2901_v52 = vld [vmem:[#allocation5 + $0x560] ss:$16 sps:$4 sm:$0xff]  }
  0x7f   :  { %1396 = vmatpush1.bf16.msra.mxu0 %v2810_v53  ;;  %1354 = vmatprep.subr.bf16.mxu1 %v2811_v54  ;;  %v2904_v53 = vld [vmem:[#allocation5 + $0x168] ss:$16 sps:$4 sm:$0xff]   ;;  %v2909_v54 = vld [vmem:[#allocation5 + $0x584] ss:$16 sps:$4 sm:$0xff]  }
  0x80   :  { %1397 = vmatprep.subr.bf16.mxu0 %v2813_v55  ;;  %v2912_v55 = vld [vmem:[#allocation5 + $0x18c] ss:$16 sps:$4 sm:$0xff]  }
  0x82   :  { %1355 = vmatpush1.bf16.msra.mxu1 %v2815_v56  ;;  %v2907_v56 = vld [vmem:[#allocation5 + $0x580] ss:$16 sps:$4 sm:$0xff]  }
  0x83   :  { %1398 = vmatpush1.bf16.msra.mxu0 %v2816_v57  ;;  %1356 = vmatprep.subr.bf16.mxu1 %v2817_v58  ;;  %v2910_v57 = vld [vmem:[#allocation5 + $0x188] ss:$16 sps:$4 sm:$0xff]   ;;  %v2915_v58 = vld [vmem:[#allocation5 + $0x5a4] ss:$16 sps:$4 sm:$0xff]  }
  0x84   :  { %1399 = vmatprep.subr.bf16.mxu0 %v2819_v59  ;;  %v2918_v59 = vld [vmem:[#allocation5 + $0x1ac] ss:$16 sps:$4 sm:$0xff]  }
  0x86   :  { %1357 = vmatpush1.bf16.msra.mxu1 %v2821_v60  ;;  %v2913_v60 = vld [vmem:[#allocation5 + $0x5a0] ss:$16 sps:$4 sm:$0xff]  }
  0x87   :  { %1400 = vmatpush1.bf16.msra.mxu0 %v2822_v61  ;;  %1358 = vmatprep.subr.bf16.mxu1 %v2823_v62  ;;  %v2916_v61 = vld [vmem:[#allocation5 + $0x1a8] ss:$16 sps:$4 sm:$0xff]   ;;  %v2921_v62 = vld [vmem:[#allocation5 + $0x5c4] ss:$16 sps:$4 sm:$0xff]  }
  0x88   :  { %1401 = vmatprep.subr.bf16.mxu0 %v2825_v63  ;;  %v2924_v63 = vld [vmem:[#allocation5 + $0x1cc] ss:$16 sps:$4 sm:$0xff]  }
  0x8a   :  { %1359 = vmatpush1.bf16.msra.mxu1 %v2827_v0  ;;  %v2919_v0 = vld [vmem:[#allocation5 + $0x5c0] ss:$16 sps:$4 sm:$0xff]  }
  0x8b   :  { %1402 = vmatpush1.bf16.msra.mxu0 %v2828_v1  ;;  %1500 = vmatprep.subr.bf16.mxu1 %v2840_v3  ;;  %v2922_v1 = vld [vmem:[#allocation5 + $0x1c8] ss:$16 sps:$4 sm:$0xff]   ;;  %v2930_v3 = vld [vmem:[#allocation5 + $0x1ec] ss:$16 sps:$4 sm:$0xff]  }
  0x8c   :  { %1414 = vmatprep.subr.bf16.mxu0 %v2837_v2  ;;  %v2927_v2 = vld [vmem:[#allocation5 + $0x5e4] ss:$16 sps:$4 sm:$0xff]  }
  0x8d   :  { %1361 = vmatmul.mubr.bf16.vlgmr.msra.gmra.mrb[0].mxu1 %v3375_v4 }
  0x8e   :  { %1404 = vmatmul.mubr.bf16.vlgmr.msra.gmra.mrb[0].mxu0 %v3377_v5  ;;  %1501 = vmatpush1.bf16.msra.mxu1 %v2838_v7  ;;  %v2928_v7 = vld [vmem:[#allocation5 + $0x1e8] ss:$16 sps:$4 sm:$0xff]  }
  0x8f   :  { %1415 = vmatpush1.bf16.msra.mxu0 %v2835_v6  ;;  %1502 = vmatprep.subr.bf16.mxu1 %v2846_v9  ;;  %v2925_v6 = vld [vmem:[#allocation5 + $0x5e0] ss:$16 sps:$4 sm:$0xff]   ;;  %v2942_v9 = vld [vmem:[#allocation5 + $0x604] ss:$16 sps:$4 sm:$0xff]  }
  0x90   :  { %1416 = vmatprep.subr.bf16.mxu0 %v2843_v8  ;;  %1532 = vmatprep.mubr.bf16.mxu1 %v2831_v49  ;;  %v2903_v49 = vld [vmem:[#allocation5 + $0x564] ss:$16 sps:$4 sm:$0xff]   ;;  %v2936_v8 = vld [vmem:[#allocation5 + $0x20c] ss:$16 sps:$4 sm:$0xff]  }
  0x91   :  { %1446 = vmatprep.mubr.bf16.mxu0 %v3381_v34 }
  0x92   :  { %1503 = vmatpush1.bf16.msra.mxu1 %v2844_v11  ;;  %v2934_v11 = vld [vmem:[#allocation5 + $0x208] ss:$16 sps:$4 sm:$0xff]  }
  0x93   :  { %1417 = vmatpush1.bf16.msra.mxu0 %v2841_v10  ;;  %1504 = vmatprep.subr.bf16.mxu1 %v2852_v13  ;;  %v3384_v10 = vld [vmem:[#allocation2 + $0x10] ss:$28 sps:$4 sm:$0xff]   ;;  %v2939_v13 = vld [vmem:[#allocation5 + $0x22c] ss:$16 sps:$4 sm:$0xff]  }
  0x94   :  { %1418 = vmatprep.subr.bf16.mxu0 %v2849_v12  ;;  %v2940_v12 = vld [vmem:[#allocation5 + $0x600] ss:$16 sps:$4 sm:$0xff]  }
  0x96   :  { %1505 = vmatpush1.bf16.msra.mxu1 %v2850_v15  ;;  %v2945_v15 = vld [vmem:[#allocation5 + $0x24c] ss:$16 sps:$4 sm:$0xff]  }
  0x97   :  { %1419 = vmatpush1.bf16.msra.mxu0 %v2847_v14  ;;  %1506 = vmatprep.subr.bf16.mxu1 %v2858_v17  ;;  %v2937_v14 = vld [vmem:[#allocation5 + $0x228] ss:$16 sps:$4 sm:$0xff]   ;;  %v3033_v17 = vld [vmem:[#allocation5 + $0x60c] ss:$16 sps:$4 sm:$0xff]  }
  0x98   :  { %1420 = vmatprep.subr.bf16.mxu0 %v2855_v16  ;;  %v3279_v16 = vmov 0  }
  0x9a   :  { %1507 = vmatpush1.bf16.msra.mxu1 %v2856_v19  ;;  %v2949_v19 = vld [vmem:[#allocation5 + $0x26c] ss:$16 sps:$4 sm:$0xff]  }
  0x9b   :  { %1421 = vmatpush1.bf16.msra.mxu0 %v2853_v18  ;;  %1508 = vmatprep.subr.bf16.mxu1 %v2864_v21  ;;  %v2943_v18 = vld [vmem:[#allocation5 + $0x248] ss:$16 sps:$4 sm:$0xff]  }
  0x9c   :  { %1422 = vmatprep.subr.bf16.mxu0 %v2861_v20  ;;  %v2946_v20 = vld [vmem:[#allocation2 + $0x18] ss:$28 sps:$4 sm:$0xff]   ;;  %v2947_v21 = vld [vmem:[#allocation5 + $0x268] ss:$16 sps:$4 sm:$0xff]  }
  0x9e   :  { %1509 = vmatpush1.bf16.msra.mxu1 %v2862_v23  ;;  %v2952_v23 = vld [vmem:[#allocation5 + $0x28c] ss:$16 sps:$4 sm:$0xff]  }
  0x9f   :  { %1423 = vmatpush1.bf16.msra.mxu0 %v2859_v22  ;;  %1510 = vmatprep.subr.bf16.mxu1 %v2870_v25  ;;  %v3031_v22 = vld [vmem:[#allocation5 + $0x608] ss:$16 sps:$4 sm:$0xff]   ;;  %v2958_v25 = vld [vmem:[#allocation5 + $0x2cc] ss:$16 sps:$4 sm:$0xff]  }
  0xa0   :  { %1424 = vmatprep.subr.bf16.mxu0 %v2867_v24  ;;  %v2955_v24 = vld [vmem:[#allocation5 + $0x2ac] ss:$16 sps:$4 sm:$0xff]  }
  0xa2   :  { %1511 = vmatpush1.bf16.msra.mxu1 %v2868_v27  ;;  %v2961_v27 = vld [vmem:[#allocation5 + $0x2ec] ss:$16 sps:$4 sm:$0xff]  }
  0xa3   :  { %1425 = vmatpush1.bf16.msra.mxu0 %v2865_v26  ;;  %1512 = vmatprep.subr.bf16.mxu1 %v2876_v29  ;;  %v2956_v26 = vld [vmem:[#allocation5 + $0x2c8] ss:$16 sps:$4 sm:$0xff]   ;;  %v3039_v29 = vld [vmem:[#allocation7 + $0x4] ss:$8 sps:$4 sm:$0xff]  }
  0xa4   :  { %1426 = vmatprep.subr.bf16.mxu0 %v2873_v28  ;;  %v3037_v28 = vld [vmem:[#allocation7] ss:$8 sps:$4 sm:$0xff]  }
  0xa6   :  { %1513 = vmatpush1.bf16.msra.mxu1 %v2874_v31  ;;  %v2959_v31 = vld [vmem:[#allocation5 + $0x2e8] ss:$16 sps:$4 sm:$0xff]  }
  0xa7   :  { %1427 = vmatpush1.bf16.msra.mxu0 %v2871_v30  ;;  %1514 = vmatprep.subr.bf16.mxu1 %v2882_v33  ;;  %v3042_v30 = vld [vmem:[#allocation7 + $0x14] ss:$8 sps:$4 sm:$0xff]   ;;  %v3040_v33 = vld [vmem:[#allocation7 + $0x10] ss:$8 sps:$4 sm:$0xff]  }
  0xa8   :  { %1428 = vmatprep.subr.bf16.mxu0 %v2879_v32  ;;  %v2964_v32 = vld [vmem:[#allocation5 + $0x30c] ss:$16 sps:$4 sm:$0xff]  }
  0xaa   :  { %1515 = vmatpush1.bf16.msra.mxu1 %v2880_v36  ;;  %v2962_v36 = vld [vmem:[#allocation5 + $0x308] ss:$16 sps:$4 sm:$0xff]  }
  0xab   :  { %1429 = vmatpush1.bf16.msra.mxu0 %v2877_v35  ;;  %1516 = vmatprep.subr.bf16.mxu1 %v2888_v38  ;;  %v3045_v35 = vld [vmem:[#allocation7 + $0x24] ss:$8 sps:$4 sm:$0xff]   ;;  %v3043_v38 = vld [vmem:[#allocation7 + $0x20] ss:$8 sps:$4 sm:$0xff]  }
  0xac   :  { %1430 = vmatprep.subr.bf16.mxu0 %v2885_v37  ;;  %v2967_v37 = vld [vmem:[#allocation5 + $0x32c] ss:$16 sps:$4 sm:$0xff]  }
  0xae   :  { %1517 = vmatpush1.bf16.msra.mxu1 %v2886_v40  ;;  %v3048_v40 = vld [vmem:[#allocation7 + $0x34] ss:$8 sps:$4 sm:$0xff]  }
  0xaf   :  { %1431 = vmatpush1.bf16.msra.mxu0 %v2883_v39  ;;  %1518 = vmatprep.subr.bf16.mxu1 %v2894_v42  ;;  %v2965_v39 = vld [vmem:[#allocation5 + $0x328] ss:$16 sps:$4 sm:$0xff]  }
  0xb0   :  { %1432 = vmatprep.subr.bf16.mxu0 %v2891_v41  ;;  %v2970_v41 = vld [vmem:[#allocation5 + $0x34c] ss:$16 sps:$4 sm:$0xff]   ;;  %v3046_v42 = vld [vmem:[#allocation7 + $0x30] ss:$8 sps:$4 sm:$0xff]  }
  0xb2   :  { %1519 = vmatpush1.bf16.msra.mxu1 %v2892_v44  ;;  %v2968_v44 = vld [vmem:[#allocation5 + $0x348] ss:$16 sps:$4 sm:$0xff]  }
  0xb3   :  { %1433 = vmatpush1.bf16.msra.mxu0 %v2889_v43  ;;  %1520 = vmatprep.subr.bf16.mxu1 %v2900_v46  ;;  %v3051_v43 = vld [vmem:[#allocation7 + $0x44] ss:$8 sps:$4 sm:$0xff]   ;;  %v3049_v46 = vld [vmem:[#allocation7 + $0x40] ss:$8 sps:$4 sm:$0xff]  }
  0xb4   :  { %1434 = vmatprep.subr.bf16.mxu0 %v2897_v45  ;;  %v2973_v45 = vld [vmem:[#allocation5 + $0x36c] ss:$16 sps:$4 sm:$0xff]  }
  0xb6   :  { %1521 = vmatpush1.bf16.msra.mxu1 %v2898_v48  ;;  %v2971_v48 = vld [vmem:[#allocation5 + $0x368] ss:$16 sps:$4 sm:$0xff]  }
  0xb7   :  { %1435 = vmatpush1.bf16.msra.mxu0 %v2895_v47  ;;  %1522 = vmatprep.subr.bf16.mxu1 %v2906_v50  ;;  %v3054_v47 = vld [vmem:[#allocation7 + $0x54] ss:$8 sps:$4 sm:$0xff]   ;;  %v3052_v50 = vld [vmem:[#allocation7 + $0x50] ss:$8 sps:$4 sm:$0xff]  }
  0xb8   :  { %1436 = vmatprep.subr.bf16.mxu0 %v2903_v49  ;;  %v2976_v49 = vld [vmem:[#allocation5 + $0x38c] ss:$16 sps:$4 sm:$0xff]  }
  0xba   :  { %1523 = vmatpush1.bf16.msra.mxu1 %v2904_v53  ;;  %v2974_v53 = vld [vmem:[#allocation5 + $0x388] ss:$16 sps:$4 sm:$0xff]  }
  0xbb   :  { %1437 = vmatpush1.bf16.msra.mxu0 %v2901_v52  ;;  %1524 = vmatprep.subr.bf16.mxu1 %v2912_v55  ;;  %v3057_v52 = vld [vmem:[#allocation7 + $0x64] ss:$8 sps:$4 sm:$0xff]   ;;  %v3055_v55 = vld [vmem:[#allocation7 + $0x60] ss:$8 sps:$4 sm:$0xff]  }
  0xbc   :  { %1438 = vmatprep.subr.bf16.mxu0 %v2909_v54  ;;  %v2979_v54 = vld [vmem:[#allocation5 + $0x3ac] ss:$16 sps:$4 sm:$0xff]  }
  0xbe   :  { %1525 = vmatpush1.bf16.msra.mxu1 %v2910_v57  ;;  %v2977_v57 = vld [vmem:[#allocation5 + $0x3a8] ss:$16 sps:$4 sm:$0xff]  }
  0xbf   :  { %1439 = vmatpush1.bf16.msra.mxu0 %v2907_v56  ;;  %1526 = vmatprep.subr.bf16.mxu1 %v2918_v59  ;;  %v3060_v56 = vld [vmem:[#allocation7 + $0x74] ss:$8 sps:$4 sm:$0xff]   ;;  %v3058_v59 = vld [vmem:[#allocation7 + $0x70] ss:$8 sps:$4 sm:$0xff]  }
  0xc0   :  { %1440 = vmatprep.subr.bf16.mxu0 %v2915_v58  ;;  %v2982_v58 = vld [vmem:[#allocation5 + $0x3cc] ss:$16 sps:$4 sm:$0xff]  }
  0xc2   :  { %1527 = vmatpush1.bf16.msra.mxu1 %v2916_v61  ;;  %v2980_v61 = vld [vmem:[#allocation5 + $0x3c8] ss:$16 sps:$4 sm:$0xff]  }
  0xc3   :  { %1441 = vmatpush1.bf16.msra.mxu0 %v2913_v60  ;;  %1528 = vmatprep.subr.bf16.mxu1 %v2924_v63  ;;  %v3063_v60 = vld [vmem:[#allocation7 + $0x84] ss:$8 sps:$4 sm:$0xff]   ;;  %v3061_v63 = vld [vmem:[#allocation7 + $0x80] ss:$8 sps:$4 sm:$0xff]  }
  0xc4   :  { %1442 = vmatprep.subr.bf16.mxu0 %v2921_v62  ;;  %v2985_v62 = vld [vmem:[#allocation5 + $0x3ec] ss:$16 sps:$4 sm:$0xff]  }
  0xc6   :  { %1529 = vmatpush1.bf16.msra.mxu1 %v2922_v1  ;;  %v2983_v1 = vld [vmem:[#allocation5 + $0x3e8] ss:$16 sps:$4 sm:$0xff]  }
  0xc7   :  { %1443 = vmatpush1.bf16.msra.mxu0 %v2919_v0  ;;  %1530 = vmatprep.subr.bf16.mxu1 %v2930_v3  ;;  %v3066_v0 = vld [vmem:[#allocation7 + $0x94] ss:$8 sps:$4 sm:$0xff]   ;;  %v3064_v3 = vld [vmem:[#allocation7 + $0x90] ss:$8 sps:$4 sm:$0xff]  }
  0xc8   :  { %1444 = vmatprep.subr.bf16.mxu0 %v2927_v2  ;;  %v2988_v2 = vld [vmem:[#allocation5 + $0x40c] ss:$16 sps:$4 sm:$0xff]  }
  0xca   :  { %1531 = vmatpush1.bf16.msra.mxu1 %v2928_v7  ;;  %v2986_v7 = vld [vmem:[#allocation5 + $0x408] ss:$16 sps:$4 sm:$0xff]  }
  0xcb   :  { %1445 = vmatpush1.bf16.msra.mxu0 %v2925_v6  ;;  %1543 = vmatprep.subr.bf16.mxu1 %v2936_v8  ;;  %v3069_v6 = vld [vmem:[#allocation7 + $0xa4] ss:$8 sps:$4 sm:$0xff]  }
  0xcc   :  { %1457 = vmatprep.subr.bf16.mxu0 %v2942_v9  ;;  %v2991_v8 = vld [vmem:[#allocation5 + $0x42c] ss:$16 sps:$4 sm:$0xff]   ;;  %v3067_v9 = vld [vmem:[#allocation7 + $0xa0] ss:$8 sps:$4 sm:$0xff]  }
  0xcd   :  { %1533 = vmatmul.mubr.bf16.vlgmr.msra.gmra.mrb[4].mxu1 %v3375_v4  ;;  %v2950_v4 = vld [vmem:[#allocation5 + $0x288] ss:$16 sps:$4 sm:$0xff]  }
  0xce   :  { %1447 = vmatmul.mubr.bf16.vlgmr.msra.gmra.mrb[0].mxu0 %v3384_v10  ;;  %1544 = vmatpush1.bf16.msra.mxu1 %v2934_v11  ;;  %v3072_v11 = vld [vmem:[#allocation7 + $0xb4] ss:$8 sps:$4 sm:$0xff]  }
  0xcf   :  { %1458 = vmatpush1.bf16.msra.mxu0 %v2940_v12  ;;  %1545 = vmatprep.subr.bf16.mxu1 %v2939_v13  ;;  %v2989_v12 = vld [vmem:[#allocation5 + $0x428] ss:$16 sps:$4 sm:$0xff]   ;;  %v2994_v13 = vld [vmem:[#allocation5 + $0x44c] ss:$16 sps:$4 sm:$0xff]  }
  0xd0   :  { %1489 = vmatprep.mubr.bf16.mxu0 %v3279_v16  ;;  %1575 = vmatprep.mubr.bf16.mxu1 %v3372_v51  ;;  %v2953_v51 = vld [vmem:[#allocation5 + $0x2a8] ss:$16 sps:$4 sm:$0xff]  }
  0xd1   :  { %1629 = vmatprep.subr.bf16.mxu0 %v3033_v17  ;;  %v2997_v17 = vld [vmem:[#allocation5 + $0x46c] ss:$16 sps:$4 sm:$0xff]  }
  0xd2   :  { %1546 = vmatpush1.bf16.msra.mxu1 %v2937_v14  ;;  %v3070_v14 = vld [vmem:[#allocation7 + $0xb0] ss:$8 sps:$4 sm:$0xff]  }
  0xd3   :  { %1547 = vmatprep.subr.bf16.mxu1 %v2945_v15  ;;  %v3075_v15 = vld [vmem:[#allocation7 + $0xc4] ss:$8 sps:$4 sm:$0xff]  }
  0xd6   :  { %1548 = vmatpush1.bf16.msra.mxu1 %v2943_v18  ;;  %v3073_v18 = vld [vmem:[#allocation7 + $0xc0] ss:$8 sps:$4 sm:$0xff]  }
  0xd7   :  { %1549 = vmatprep.subr.bf16.mxu1 %v2949_v19  ;;  %v3078_v19 = vld [vmem:[#allocation7 + $0xd4] ss:$8 sps:$4 sm:$0xff]  }
  0xda   :  { %2574 = vmatmul.mubr.msk.bf16.vlgmr.msra.gmra.mrb[0].mxu0 %vm1324_vm0, %v2946_v20  ;;  %1550 = vmatpush1.bf16.msra.mxu1 %v2947_v21  ;;  %v2998_v21 = vld [vmem:[#allocation5 + $0x488] ss:$16 sps:$4 sm:$0xff]  }
  0xdb   :  { %1630 = vmatpush1.bf16.msra.mxu0 %v3031_v22  ;;  %1551 = vmatprep.subr.bf16.mxu1 %v2952_v23  ;;  %v3003_v22 = vld [vmem:[#allocation5 + $0x4ac] ss:$16 sps:$4 sm:$0xff]   ;;  %v3001_v23 = vld [vmem:[#allocation5 + $0x4a8] ss:$16 sps:$4 sm:$0xff]  }
  0xdc   :  { %1661 = vmatprep.mubr.bf16.mxu0 %v3279_v16  ;;  %2080 = vmatprep.subr.bf16.mxu0 %v3039_v29  ;;  %v2992_v16 = vld [vmem:[#allocation5 + $0x448] ss:$16 sps:$4 sm:$0xff]   ;;  %v3081_v29 = vld [vmem:[#allocation7 + $0xe4] ss:$8 sps:$4 sm:$0xff]  }
  0xde   :  { %1552 = vmatpush1.bf16.msra.mxu1 %v2950_v4  ;;  %v3006_v4 = vld [vmem:[#allocation5 + $0x4cc] ss:$16 sps:$4 sm:$0xff]  }
  0xdf   :  { %1553 = vmatprep.subr.bf16.mxu1 %v2955_v24  ;;  %v3004_v24 = vld [vmem:[#allocation5 + $0x4c8] ss:$16 sps:$4 sm:$0xff]  }
  0xe2   :  { %2575 = vmatmul.mubr.msk.bf16.vlgmr.msra.gmra.mrb[4].mxu0 %vm1324_vm0, %v2946_v20  ;;  %1554 = vmatpush1.bf16.msra.mxu1 %v2953_v51  ;;  %v3000_v20 = vld [vmem:[#allocation5 + $0x48c] ss:$16 sps:$4 sm:$0xff]  }
  0xe3   :  { %1555 = vmatprep.subr.bf16.mxu1 %v2958_v25  ;;  %2081 = vmatpush1.bf16.msra.mxu0 %v3037_v28  ;;  %v3009_v51 = vld [vmem:[#allocation5 + $0x4ec] ss:$16 sps:$4 sm:$0xff]   ;;  %v3007_v25 = vld [vmem:[#allocation5 + $0x4e8] ss:$16 sps:$4 sm:$0xff]  }
  0xe4   :  { %2082 = vmatprep.subr.bf16.mxu0 %v3042_v30  ;;  %v3015_v28 = vld [vmem:[#allocation5 + $0x52c] ss:$16 sps:$4 sm:$0xff]   ;;  %v3013_v30 = vld [vmem:[#allocation5 + $0x528] ss:$16 sps:$4 sm:$0xff]  }
  0xe6   :  { %1556 = vmatpush1.bf16.msra.mxu1 %v2956_v26  ;;  %v3012_v26 = vld [vmem:[#allocation5 + $0x50c] ss:$16 sps:$4 sm:$0xff]  }
  0xe7   :  { %1557 = vmatprep.subr.bf16.mxu1 %v2961_v27  ;;  %2083 = vmatpush1.bf16.msra.mxu0 %v3040_v33  ;;  %v3010_v27 = vld [vmem:[#allocation5 + $0x508] ss:$16 sps:$4 sm:$0xff]   ;;  %v3084_v33 = vld [vmem:[#allocation7 + $0xf4] ss:$8 sps:$4 sm:$0xff]  }
  0xe8   :  { %2084 = vmatprep.subr.bf16.mxu0 %v3045_v35  ;;  %v3016_v35 = vld [vmem:[#allocation5 + $0x548] ss:$16 sps:$4 sm:$0xff]  }
  0xea   :  { %1558 = vmatpush1.bf16.msra.mxu1 %v2959_v31  ;;  %v3079_v31 = vld [vmem:[#allocation7 + $0xe0] ss:$8 sps:$4 sm:$0xff]  }
  0xeb   :  { %1559 = vmatprep.subr.bf16.mxu1 %v2964_v32  ;;  %2085 = vmatpush1.bf16.msra.mxu0 %v3043_v38  ;;  %v3018_v32 = vld [vmem:[#allocation5 + $0x54c] ss:$16 sps:$4 sm:$0xff]   ;;  %v3019_v38 = vld [vmem:[#allocation5 + $0x568] ss:$16 sps:$4 sm:$0xff]  }
  0xec   :  { %2086 = vmatprep.subr.bf16.mxu0 %v3048_v40  ;;  %v3087_v40 = vld [vmem:[#allocation7 + $0x104] ss:$8 sps:$4 sm:$0xff]  }
  0xee   :  { %1560 = vmatpush1.bf16.msra.mxu1 %v2962_v36  ;;  %v3082_v36 = vld [vmem:[#allocation7 + $0xf0] ss:$8 sps:$4 sm:$0xff]  }
  0xef   :  { %1561 = vmatprep.subr.bf16.mxu1 %v2967_v37  ;;  %2087 = vmatpush1.bf16.msra.mxu0 %v3046_v42  ;;  %v3021_v37 = vld [vmem:[#allocation5 + $0x56c] ss:$16 sps:$4 sm:$0xff]  }
  0xf0   :  { %2088 = vmatprep.subr.bf16.mxu0 %v3051_v43  ;;  %v3027_v42 = vld [vmem:[#allocation5 + $0x5ac] ss:$16 sps:$4 sm:$0xff]   ;;  %v3025_v43 = vld [vmem:[#allocation5 + $0x5a8] ss:$16 sps:$4 sm:$0xff]  }
  0xf2   :  { %1562 = vmatpush1.bf16.msra.mxu1 %v2965_v39  ;;  %v3024_v39 = vld [vmem:[#allocation5 + $0x58c] ss:$16 sps:$4 sm:$0xff]  }
  0xf3   :  { %1563 = vmatprep.subr.bf16.mxu1 %v2970_v41  ;;  %2089 = vmatpush1.bf16.msra.mxu0 %v3049_v46  ;;  %v3022_v41 = vld [vmem:[#allocation5 + $0x588] ss:$16 sps:$4 sm:$0xff]   ;;  %v3036_v46 = vld [vmem:[#allocation5 + $0x5ec] ss:$16 sps:$4 sm:$0xff]  }
  0xf4   :  { %2090 = vmatprep.subr.bf16.mxu0 %v3054_v47  ;;  %v3034_v47 = vld [vmem:[#allocation5 + $0x5e8] ss:$16 sps:$4 sm:$0xff]  }
  0xf6   :  { %1564 = vmatpush1.bf16.msra.mxu1 %v2968_v44  ;;  %v3030_v44 = vld [vmem:[#allocation5 + $0x5cc] ss:$16 sps:$4 sm:$0xff]  }
  0xf7   :  { %1565 = vmatprep.subr.bf16.mxu1 %v2973_v45  ;;  %2091 = vmatpush1.bf16.msra.mxu0 %v3052_v50  ;;  %v3028_v45 = vld [vmem:[#allocation5 + $0x5c8] ss:$16 sps:$4 sm:$0xff]  }
  0xf8   :  { %2092 = vmatprep.subr.bf16.mxu0 %v3057_v52 }
  0xfa   :  { %1566 = vmatpush1.bf16.msra.mxu1 %v2971_v48 }
  0xfb   :  { %1567 = vmatprep.subr.bf16.mxu1 %v2976_v49  ;;  %2093 = vmatpush1.bf16.msra.mxu0 %v3055_v55 }
  0xfc   :  { %2094 = vmatprep.subr.bf16.mxu0 %v3060_v56  ;;  %v3398_v56 = vld [vmem:[%s3450_s2] sm:$0xf] }
  0xfe   :  { %1568 = vmatpush1.bf16.msra.mxu1 %v2974_v53  ;;  %v289_v53 = vlaneseq }
  0xff   :  { %1569 = vmatprep.subr.bf16.mxu1 %v2979_v54  ;;  %2095 = vmatpush1.bf16.msra.mxu0 %v3058_v59 }
 0x100   :  { %2096 = vmatprep.subr.bf16.mxu0 %v3063_v60  ;;  %v3392_v54 = vshrl.u32 %v289_v53, 7  ;;  %v3121_v53 = vld [vmem:[#allocation7 + $0x1c0] ss:$8 sps:$4 sm:$0xff]  }
 0x102   :  { %1570 = vmatpush1.bf16.msra.mxu1 %v2977_v57  ;;  %v291_v55 = vsub.s32 0, %v3392_v54  ;;  %v295_v57 = vsub.s32 1, %v3392_v54 }
 0x103   :  { %1571 = vmatprep.subr.bf16.mxu1 %v2982_v58  ;;  %2097 = vmatpush1.bf16.msra.mxu0 %v3061_v63 }
 0x104   :  { %2098 = vmatprep.subr.bf16.mxu0 %v3066_v0  ;;  %v296_v58 = vrot.slane %v3398_v56, %v295_v57 }
 0x106   :  { %1572 = vmatpush1.bf16.msra.mxu1 %v2980_v61 }
 0x107   :  { %1573 = vmatprep.subr.bf16.mxu1 %v2985_v62  ;;  %2099 = vmatpush1.bf16.msra.mxu0 %v3064_v3  ;;  %v3135_v3 = vld [vmem:[#allocation8 + $0x48] sm:$0xff]  }
 0x108   :  { %2100 = vmatprep.subr.bf16.mxu0 %v3069_v6 }
 0x10a   :  { %1574 = vmatpush1.bf16.msra.mxu1 %v2983_v1  ;;  %v3133_v1 = vld [vmem:[#allocation8 + $0x40] sm:$0xff]  }
 0x10b   :  { %1586 = vmatprep.subr.bf16.mxu1 %v2988_v2  ;;  %2101 = vmatpush1.bf16.msra.mxu0 %v3067_v9  ;;  %v3134_v2 = vld [vmem:[#allocation8] sm:$0xff]  }
 0x10c   :  { %2102 = vmatprep.subr.bf16.mxu0 %v3072_v11 }
 0x10d   :  { %1576 = vmatmul.mubr.bf16.vlgmr.msra.gmra.mrb[4].mxu1 %v3377_v5  ;;  %v2995_v5 = vld [vmem:[#allocation5 + $0x468] ss:$16 sps:$4 sm:$0xff]  }
 0x10e   :  { %1587 = vmatpush1.bf16.msra.mxu1 %v2986_v7  ;;  %1618 = vmatprep.mubr.bf16.mxu1 %v3381_v34  ;;  %v3076_v34 = vld [vmem:[#allocation7 + $0xd0] ss:$8 sps:$4 sm:$0xff]  }
 0x10f   :  { %1588 = vmatprep.subr.bf16.mxu1 %v2991_v8  ;;  %2103 = vmatpush1.bf16.msra.mxu0 %v3070_v14 }
 0x110   :  { %2104 = vmatprep.subr.bf16.mxu0 %v3075_v15 }
 0x112   :  { %1589 = vmatpush1.bf16.msra.mxu1 %v2989_v12 }
 0x113   :  { %1590 = vmatprep.subr.bf16.mxu1 %v2994_v13  ;;  %2105 = vmatpush1.bf16.msra.mxu0 %v3073_v18  ;;  %v3136_v13 = vld [vmem:[#allocation8 + $0x8] sm:$0xff]  }
 0x114   :  { %2106 = vmatprep.subr.bf16.mxu0 %v3078_v19 }
 0x116   :  { %1591 = vmatpush1.bf16.msra.mxu1 %v2992_v16  ;;  %v3137_v16 = vld [vmem:[#allocation8 + $0x50] sm:$0xff]  }
 0x117   :  { %1592 = vmatprep.subr.bf16.mxu1 %v2997_v17  ;;  %2107 = vmatpush1.bf16.msra.mxu0 %v3076_v34 }
 0x118   :  { %2108 = vmatprep.subr.bf16.mxu0 %v3081_v29  ;;  %v3091_v29 = vld [vmem:[#allocation7 + $0x120] ss:$8 sps:$4 sm:$0xff]  }
 0x11a   :  { %1593 = vmatpush1.bf16.msra.mxu1 %v2995_v5 }
 0x11b   :  { %1594 = vmatprep.subr.bf16.mxu1 %v3000_v20  ;;  %2109 = vmatpush1.bf16.msra.mxu0 %v3079_v31  ;;  %v3085_v20 = vld [vmem:[#allocation7 + $0x100] ss:$8 sps:$4 sm:$0xff]   ;;  %v3096_v31 = vld [vmem:[#allocation7 + $0x134] ss:$8 sps:$4 sm:$0xff]  }
 0x11c   :  { %2110 = vmatprep.subr.bf16.mxu0 %v3084_v33  ;;  %v3094_v33 = vld [vmem:[#allocation7 + $0x130] ss:$8 sps:$4 sm:$0xff]  }
 0x11e   :  { %1595 = vmatpush1.bf16.msra.mxu1 %v2998_v21  ;;  %v3138_v21 = vld [vmem:[#allocation8 + $0x10] sm:$0xff]  }
 0x11f   :  { %1596 = vmatprep.subr.bf16.mxu1 %v3003_v22  ;;  %2111 = vmatpush1.bf16.msra.mxu0 %v3082_v36  ;;  %v3090_v22 = vld [vmem:[#allocation7 + $0x114] ss:$8 sps:$4 sm:$0xff]   ;;  %v3097_v36 = vld [vmem:[#allocation7 + $0x140] ss:$8 sps:$4 sm:$0xff]  }
 0x120   :  { %2123 = vmatprep.subr.bf16.mxu0 %v3087_v40  ;;  %v3103_v40 = vld [vmem:[#allocation7 + $0x160] ss:$8 sps:$4 sm:$0xff]  }
 0x122   :  { %1597 = vmatpush1.bf16.msra.mxu1 %v3001_v23 }
 0x123   :  { %1598 = vmatprep.subr.bf16.mxu1 %v3006_v4  ;;  %v3139_v4 = vld [vmem:[#allocation8 + $0x58] sm:$0xff]  }
 0x126   :  { %1599 = vmatpush1.bf16.msra.mxu1 %v3004_v24 }
 0x127   :  { %1600 = vmatprep.subr.bf16.mxu1 %v3009_v51 }
 0x12a   :  { %1601 = vmatpush1.bf16.msra.mxu1 %v3007_v25  ;;  %v3088_v25 = vld [vmem:[#allocation7 + $0x110] ss:$8 sps:$4 sm:$0xff]  }
 0x12b   :  { %1602 = vmatprep.subr.bf16.mxu1 %v3012_v26  ;;  %v3140_v26 = vld [vmem:[#allocation8 + $0x18] sm:$0xff]  }
 0x12e   :  { %1603 = vmatpush1.bf16.msra.mxu1 %v3010_v27  ;;  %v3093_v27 = vld [vmem:[#allocation7 + $0x124] ss:$8 sps:$4 sm:$0xff]  }
 0x12f   :  { %1604 = vmatprep.subr.bf16.mxu1 %v3015_v28  ;;  %v3141_v28 = vld [vmem:[#allocation8 + $0x60] sm:$0xff]  }
 0x132   :  { %1605 = vmatpush1.bf16.msra.mxu1 %v3013_v30  ;;  %v3142_v30 = vld [vmem:[#allocation8 + $0x20] sm:$0xff]  }
 0x133   :  { %1606 = vmatprep.subr.bf16.mxu1 %v3018_v32  ;;  %v3143_v32 = vld [vmem:[#allocation8 + $0x68] sm:$0xff]  }
 0x136   :  { %1607 = vmatpush1.bf16.msra.mxu1 %v3016_v35  ;;  %v3099_v35 = vld [vmem:[#allocation7 + $0x144] ss:$8 sps:$4 sm:$0xff]  }
 0x137   :  { %1608 = vmatprep.subr.bf16.mxu1 %v3021_v37  ;;  %v3102_v37 = vld [vmem:[#allocation7 + $0x154] ss:$8 sps:$4 sm:$0xff]  }
 0x13a   :  { %1609 = vmatpush1.bf16.msra.mxu1 %v3019_v38  ;;  %v3100_v38 = vld [vmem:[#allocation7 + $0x150] ss:$8 sps:$4 sm:$0xff]  }
 0x13b   :  { %1610 = vmatprep.subr.bf16.mxu1 %v3024_v39  ;;  %v3105_v39 = vld [vmem:[#allocation7 + $0x164] ss:$8 sps:$4 sm:$0xff]  }
 0x13e   :  { %1611 = vmatpush1.bf16.msra.mxu1 %v3022_v41  ;;  %v3108_v41 = vld [vmem:[#allocation7 + $0x174] ss:$8 sps:$4 sm:$0xff]  }
 0x13f   :  { %1612 = vmatprep.subr.bf16.mxu1 %v3027_v42  ;;  %v3106_v42 = vld [vmem:[#allocation7 + $0x170] ss:$8 sps:$4 sm:$0xff]  }
 0x142   :  { %1613 = vmatpush1.bf16.msra.mxu1 %v3025_v43  ;;  %v3111_v43 = vld [vmem:[#allocation7 + $0x184] ss:$8 sps:$4 sm:$0xff]  }
 0x143   :  { %1614 = vmatprep.subr.bf16.mxu1 %v3030_v44  ;;  %v3109_v44 = vld [vmem:[#allocation7 + $0x180] ss:$8 sps:$4 sm:$0xff]  }
 0x146   :  { %1615 = vmatpush1.bf16.msra.mxu1 %v3028_v45  ;;  %v3114_v45 = vld [vmem:[#allocation7 + $0x194] ss:$8 sps:$4 sm:$0xff]  }
 0x147   :  { %1616 = vmatprep.subr.bf16.mxu1 %v3036_v46  ;;  %v3112_v46 = vld [vmem:[#allocation7 + $0x190] ss:$8 sps:$4 sm:$0xff]  }
 0x14a   :  { %1617 = vmatpush1.bf16.msra.mxu1 %v3034_v47  ;;  %v3117_v47 = vld [vmem:[#allocation7 + $0x1a4] ss:$8 sps:$4 sm:$0xff]  }
 0x14b   :  { %2657 = vmatprep.subr.bf16.mxu1 %v3133_v1 }
 0x14d   :  { %1619 = vmatmul.mubr.bf16.vlgmr.msra.gmra.mrb[4].mxu1 %v3384_v10  ;;  %v292_v10 = vrot.slane %v3398_v56, %v291_v55 }
 0x14e   :  { %2658 = vmatpush3.bf16.msra.mxu1 %v3134_v2 }
 0x14f   :  { %2659 = vmatprep.subr.bf16.mxu1 %v3135_v3 }
 0x152   :  { %2660 = vmatpush3.bf16.msra.mxu1 %v3136_v13 }
 0x153   :  { %2661 = vmatprep.subr.bf16.mxu1 %v3137_v16 }
 0x156   :  { %2662 = vmatpush3.bf16.msra.mxu1 %v3138_v21 }
 0x157   :  { %2663 = vmatprep.subr.bf16.mxu1 %v3139_v4  ;;  %v3146_v4 = vld [vmem:[#allocation8 + $0x30] sm:$0xff]  }
 0x15a   :  { %2664 = vmatpush3.bf16.msra.mxu1 %v3140_v26 }
 0x15b   :  { %2665 = vmatprep.subr.bf16.mxu1 %v3141_v28 }
 0x15e   :  { %2666 = vmatpush3.bf16.msra.mxu1 %v3142_v30 }
 0x15f   :  { %2667 = vmatprep.subr.bf16.mxu1 %v3143_v32 }
 0x160   :  { %v1362_v48 = vpop.f32.mrb[0].mxu1 }
 0x161   :  { %v1364_v49 = vpop.f32.mrb[1].mxu1  ;;  %v1363_v59 = vadd.f32 %v1362_v48, %v292_v10  ;;  %v3115_v48 = vld [vmem:[#allocation7 + $0x1a0] ss:$8 sps:$4 sm:$0xff]  }
 0x162   :  { %v1366_v50 = vpop.f32.mrb[2].mxu1  ;;  %v1365_v60 = vadd.f32 %v1364_v49, %v296_v58  ;;  %v3120_v49 = vld [vmem:[#allocation7 + $0x1b4] ss:$8 sps:$4 sm:$0xff]  }
 0x163   :  { %v1368_v52 = vpop.f32.mrb[3].mxu1  ;;  %v1367_v62 = vadd.f32 %v1366_v50, %v292_v10  ;;  %v3118_v50 = vld [vmem:[#allocation7 + $0x1b0] ss:$8 sps:$4 sm:$0xff]   ;;  %v3126_v10 = vld [vmem:[#allocation7 + $0x1d4] ss:$8 sps:$4 sm:$0xff]  }
 0x164   :  { %v1369_v6 = vadd.f32 %v1368_v52, %v296_v58  ;;  %v3123_v52 = vld [vmem:[#allocation7 + $0x1c4] ss:$8 sps:$4 sm:$0xff]   ;;  %v3124_v58 = vld [vmem:[#allocation7 + $0x1d0] ss:$8 sps:$4 sm:$0xff]  }
 0x1ad   :  { %v1491_v61 = vpop.f32.mrb[0].mxu0 }
 0x1ae   :  { %v2680_v63 = vadd.f32 %v1491_v61, %v1363_v59  ;;  %v1493_v0 = vpop.f32.mrb[1].mxu0  ;;  %v3129_v59 = vld [vmem:[#allocation7 + $0x1e4] ss:$8 sps:$4 sm:$0xff]   ;;  %v3132_v61 = vld [vmem:[#allocation7 + $0x1f4] ss:$8 sps:$4 sm:$0xff]  }
 0x1af   :  { %v2682_v7 = vadd.f32 %v1493_v0, %v1365_v60  ;;  %v1495_v8 = vpop.f32.mrb[2].mxu0  ;;  %v3127_v60 = vld [vmem:[#allocation7 + $0x1e0] ss:$8 sps:$4 sm:$0xff]   ;;  %v303_v0 = vsub.s32 3, %v3392_v54 }
 0x1b0   :  { %v2684_v9 = vadd.f32 %v1495_v8, %v1367_v62  ;;  %v1497_v11 = vpop.f32.mrb[3].mxu0  ;;  %v1672_v14 = vmax.f32 %v2680_v63, 0.0  ;;  %v3130_v62 = vld [vmem:[#allocation7 + $0x1f0] ss:$8 sps:$4 sm:$0xff]   ;;  %v299_v63 = vsub.s32 2, %v3392_v54 }
 0x1b1   :  { %v2686_v12 = vadd.f32 %v1497_v11, %v1369_v6  ;;  %v1673_v17 = vmax.f32 %v2682_v7, 0.0  ;;  %v304_v2 = vrot.slane %v3398_v56, %v303_v0  ;;  %v2640_v54 = vld [vmem:[%s3454_s6] ss:$0 sm:$0xff] }
 0x1b2   :  { %v1676_v15 = vmax.f32 %v2684_v9, 0.0  ;;  %v300_v1 = vrot.slane %v3398_v56, %v299_v63 }
 0x1b3   :  { %v1677_v18 = vmax.f32 %v2686_v12, 0.0 }
 0x1b4   :  { %v1680_v19 = vpack.c.bf16 %v1676_v15, %v1672_v14 }
 0x1b5   :  { %v1681_v5 = vpack.c.bf16 %v1677_v18, %v1673_v17  ;;  %v3407_v34 = vpop.f32.mrb[4].mxu0 }
 0x1b6   :  { %v3409_v23 = vpop.f32.mrb[5].mxu0 }
 0x1b7   :  { %2112 = vmatprep.mubr.bf16.mxu0 %v1681_v5  ;;  %v3411_v24 = vpop.f32.mrb[6].mxu0 }
 0x1b8   :  { %2113 = vmatmul.mubr.bf16.vlgmr.msra.gmra.mrb[8].mxu0 %v1680_v19  ;;  %v3413_v51 = vpop.f32.mrb[7].mxu0 }
 0x1b9   :  { %2124 = vmatpush1.bf16.msra.mxu0 %v3085_v20 }
 0x1ba   :  { %2125 = vmatprep.subr.bf16.mxu0 %v3090_v22  ;;  %v3144_v22 = vld [vmem:[#allocation8 + $0x28] sm:$0xff]  }
 0x1bb   :  { %2668 = vmatpush3.bf16.msra.mxu1 %v3144_v22 }
 0x1bd   :  { %2126 = vmatpush1.bf16.msra.mxu0 %v3088_v25  ;;  %v3148_v25 = vld [vmem:[#allocation8 + $0x38] sm:$0xff]  }
 0x1be   :  { %2127 = vmatprep.subr.bf16.mxu0 %v3093_v27 }
 0x1c1   :  { %2128 = vmatpush1.bf16.msra.mxu0 %v3091_v29 }
 0x1c2   :  { %2129 = vmatprep.subr.bf16.mxu0 %v3096_v31 }
 0x1c5   :  { %2130 = vmatpush1.bf16.msra.mxu0 %v3094_v33 }
 0x1c6   :  { %2131 = vmatprep.subr.bf16.mxu0 %v3099_v35 }
 0x1c9   :  { %2132 = vmatpush1.bf16.msra.mxu0 %v3097_v36 }
 0x1ca   :  { %2133 = vmatprep.subr.bf16.mxu0 %v3102_v37 }
 0x1cd   :  { %2134 = vmatpush1.bf16.msra.mxu0 %v3100_v38 }
 0x1ce   :  { %2135 = vmatprep.subr.bf16.mxu0 %v3105_v39 }
 0x1d1   :  { %2136 = vmatpush1.bf16.msra.mxu0 %v3103_v40 }
 0x1d2   :  { %2137 = vmatprep.subr.bf16.mxu0 %v3108_v41 }
 0x1d5   :  { %2138 = vmatpush1.bf16.msra.mxu0 %v3106_v42 }
 0x1d6   :  { %2139 = vmatprep.subr.bf16.mxu0 %v3111_v43 }
 0x1d9   :  { %2140 = vmatpush1.bf16.msra.mxu0 %v3109_v44 }
 0x1da   :  { %2141 = vmatprep.subr.bf16.mxu0 %v3114_v45 }
 0x1dd   :  { %2142 = vmatpush1.bf16.msra.mxu0 %v3112_v46 }
 0x1de   :  { %2143 = vmatprep.subr.bf16.mxu0 %v3117_v47 }
 0x1e1   :  { %2144 = vmatpush1.bf16.msra.mxu0 %v3115_v48 }
 0x1e2   :  { %2145 = vmatprep.subr.bf16.mxu0 %v3120_v49 }
 0x1e5   :  { %2146 = vmatpush1.bf16.msra.mxu0 %v3118_v50 }
 0x1e6   :  { %2147 = vmatprep.subr.bf16.mxu0 %v3123_v52 }
 0x1e9   :  { %2148 = vmatpush1.bf16.msra.mxu0 %v3121_v53 }
 0x1ea   :  { %2149 = vmatprep.subr.bf16.mxu0 %v3126_v10 }
 0x1ed   :  { %2150 = vmatpush1.bf16.msra.mxu0 %v3124_v58 }
 0x1ee   :  { %2151 = vmatprep.subr.bf16.mxu0 %v3129_v59 }
 0x1f1   :  { %2152 = vmatpush1.bf16.msra.mxu0 %v3127_v60 }
 0x1f2   :  { %2153 = vmatprep.subr.bf16.mxu0 %v3132_v61 }
 0x1f5   :  { %2154 = vmatpush1.bf16.msra.mxu0 %v3130_v62 }
 0x220   :  { %v1620_v3 = vpop.f32.mrb[4].mxu1 }
 0x221   :  { %v2687_v6 = vadd.f32 %v1620_v3, %v300_v1  ;;  %v1622_v7 = vpop.f32.mrb[5].mxu1 }
 0x222   :  { %v2689_v8 = vadd.f32 %v1622_v7, %v304_v2  ;;  %v1624_v9 = vpop.f32.mrb[6].mxu1 }
 0x223   :  { %v2688_v11 = vadd.f32 %v2687_v6, %v3407_v34  ;;  %v2691_v12 = vadd.f32 %v1624_v9, %v300_v1  ;;  %v1626_v13 = vpop.f32.mrb[7].mxu1  ;;  %v3145_v34 = vld [vmem:[#allocation8 + $0x70] sm:$0xff]  }
 0x224   :  { %v2690_v14 = vadd.f32 %v2689_v8, %v3409_v23  ;;  %v2693_v15 = vadd.f32 %v1626_v13, %v304_v2  ;;  %2669 = vmatprep.subr.bf16.mxu1 %v3145_v34  ;;  %v3147_v23 = vld [vmem:[#allocation8 + $0x78] sm:$0xff]  }
 0x225   :  { %v2692_v16 = vadd.f32 %v2691_v12, %v3411_v24  ;;  %v1674_v18 = vmax.f32 %v2688_v11, 0.0  ;;  %2670 = vmatpush3.bf16.msra.mxu1 %v3146_v4  ;;  %v1748_v24 = vld [vmem:[%s3452_s4] sm:$0x3] }
 0x226   :  { %v2694_v17 = vadd.f32 %v2693_v15, %v3413_v51  ;;  %v1675_v5 = vmax.f32 %v2690_v14, 0.0  ;;  %2671 = vmatprep.subr.bf16.mxu1 %v3147_v23  ;;  %v1753_v51 = vrot.slane %v1748_v24, %v291_v55  ;;  %v1757_v26 = vrot.slane %v1748_v24, %v295_v57 }
 0x227   :  { %v1678_v19 = vmax.f32 %v2692_v16, 0.0 }
 0x228   :  { %v1679_v56 = vmax.f32 %v2694_v17, 0.0 }
 0x229   :  { %v1682_v20 = vpack.c.bf16 %v1678_v19, %v1674_v18  ;;  %2672 = vmatpush3.bf16.msra.mxu1 %v3148_v25 }
 0x22a   :  { %v1683_v21 = vpack.c.bf16 %v1679_v56, %v1675_v5 }
 0x22c   :  { %2155 = vmatprep.mubr.bf16.mxu0 %v1683_v21 }
 0x22d   :  { %2156 = vmatmul.mubr.bf16.vlgmr.msra.gmra.mrb[8].mxu0 %v1682_v20 }
 0x300   :  { %v2157_v27 = vpop.f32.mrb[8].mxu0 }
 0x301   :  { %v2695_v28 = vadd.f32 %v2157_v27, %v1753_v51  ;;  %v2159_v29 = vpop.f32.mrb[9].mxu0 }
 0x302   :  { %v2696_v30 = vadd.f32 %v2159_v29, %v1757_v26  ;;  %v2161_v31 = vpop.f32.mrb[10].mxu0 }
 0x303   :  { %v2697_v32 = vadd.f32 %v2161_v31, %v1753_v51  ;;  %v2163_v33 = vpop.f32.mrb[11].mxu0  ;;  %v2166_v36 = vmax.f32 %v2695_v28, 0.0 }
 0x304   :  { %v2698_v35 = vadd.f32 %v2163_v33, %v1757_v26  ;;  %v2167_v38 = vmax.f32 %v2696_v30, 0.0 }
 0x305   :  { %v2168_v37 = vmax.f32 %v2697_v32, 0.0 }
 0x306   :  { %v2169_v39 = vmax.f32 %v2698_v35, 0.0 }
 0x307   :  { %v2170_v40 = vpack.c.bf16 %v2168_v37, %v2166_v36 }
 0x308   :  { %v2171_v41 = vpack.c.bf16 %v2169_v39, %v2167_v38 }
 0x30a   :  { %2339 = vmatprep.mubr.bf16.mxu1 %v2171_v41 }
 0x30b   :  { %2340 = vmatmul.mubr.bf16.vlgmr.msra.gmra.mrb[8].mxu1 %v2170_v40 }
 0x3de   :  { %v2673_v55 = vpop.f32.mrb[8].mxu1 }
 0x3df   :  { %v2674_v57 = vpop.f32.mrb[9].mxu1 }
 0x3e0   :  { %v2675_v42 = vadd.f32 %v2674_v57, %v2673_v55  ;;  %v2676_v43 = vpop.f32.mrb[10].mxu1 }
 0x3e1   :  { %v2677_v44 = vpop.f32.mrb[11].mxu1 }
 0x3e2   :  { %v2342_v45 = vadd.f32 %v2675_v42, %v2640_v54  ;;  %v2678_v46 = vadd.f32 %v2677_v44, %v2676_v43 }
 0x3e4   :  { %v2348_v47 = vmax.f32 %v2342_v45, 0.0  ;;  %v2345_v48 = vadd.f32 %v2678_v46, %v2640_v54 }
 0x3e6   :  { %2350 = vst [vmem:[#allocation10] sm:$0xff] %v2348_v47  ;;  %v2349_v49 = vmax.f32 %v2345_v48, 0.0 }
 0x3e8   :  { %2351 = vst [vmem:[#allocation10 + $0x8] sm:$0xff] %v2349_v49 }
 0x3e9   :  { %3248 = shalt.err (!%p3245_p8)
}
 0x3ea   :  { %s3249_s14 = scalar_lea.hbm %s3455_s7, 256 }
 0x3eb   :  { %p3250_p9 = scmp.ne.s32.totalorder %s3455_s7, %s3249_s14  ;;  %p3253_p10 = scmp.lt.u32.totalorder %s3249_s14, %s3455_s7 }
 0x3ed   :  { %p3255_p11 = pnand %p3253_p10, %p3250_p9 }
 0x3ef   :  { %3258 = shalt.err (!%p3255_p11)
}
 0x3f0   :  { %2363 = dma.vmem_to_hbm [thread:$0]  %s2358_s11, 256, %s3455_s7, [#allocation4], %s3274_s0, %s3274_s0, %s3275_s15  }
 0x3f1   :  { %3265 = dma.done.wait [#allocation4], 256  }
 0x3f2   :  { %3266 = vsyncadd [#allocation4], 4294967040 }
 0x3f3   :  { %2367 = vsyncpa [#allocation3], 1 }
 0x3f4   :  { %2368 = vsyncpa [#allocation6], 1 }
 0x3f5   :  { %2369 = vsyncpa [#allocation9], 1 }
 0x3f6   :  { %2370 = vsyncpa [#allocation4], 1 }

</bundles_post_ra>
